<compile_context>
chip_gen: v7x
topology: tpu7x:2x2x1
jax: 0.10.0
libtpu: 0.0.40
codegen_flags: <defaults>
</compile_context>

<pallas_src>
import jax
import jax.numpy as jnp
from jax.experimental import pallas as pl
from jax.experimental.pallas import tpu as pltpu


def _sublane_multiple(dtype):
    # Minimum second-minor tile: (8,128) f32, (16,128) bf16, (32,128) int8/fp8.
    return {4: 8, 2: 16, 1: 32}.get(jnp.dtype(dtype).itemsize, 8)


def _vmem_capacity_bytes():
    try:
        return int(pltpu.get_tpu_info().vmem_capacity_bytes)
    except Exception:
        return 64 * 1024 * 1024  # conservative default: v7x per-core VMEM


def _is_dual_tensorcore_chip():
    # v7x is the first generation with two TensorCores per chip.
    try:
        kind = jax.devices()[0].device_kind.lower().replace(" ", "")
    except Exception:
        return False
    return ("v7" in kind) or ("tpu7" in kind)


def _lora_kernel(x_ref, a_ref, b_ref, bias_ref, o_ref):
    # x: (TM, K)   a: (K, R)   b: (R, N)   bias: (1, N)   o: (TM, N)
    # Both low-rank projections on the MXU with f32 accumulation; the output
    # tile is touched exactly once (bias add + cast + store).
    t = jnp.dot(x_ref[...], a_ref[...], preferred_element_type=jnp.float32)
    y = jnp.dot(t, b_ref[...].astype(jnp.float32),
                preferred_element_type=jnp.float32)
    o_ref[...] = (y + bias_ref[...].astype(jnp.float32)).astype(o_ref.dtype)


def lora_forward(x, a, b, bias, *, tile_m=1024):
    M, K = x.shape
    Ka, R = a.shape
    Rb, N = b.shape
    assert K == Ka and R == Rb and bias.shape == (N,)

    out_dtype = x.dtype
    sub = _sublane_multiple(x.dtype)

    x_sz = jnp.dtype(x.dtype).itemsize
    a_sz = jnp.dtype(a.dtype).itemsize
    b_sz = jnp.dtype(b.dtype).itemsize
    s_sz = jnp.dtype(bias.dtype).itemsize
    o_sz = jnp.dtype(out_dtype).itemsize

    # Generation-aware VMEM budget: ~100 MiB usable on v5e/v6e (128 MiB
    # physical), ~50 MiB on v7x (64 MiB physical).
    capacity = _vmem_capacity_bytes()
    budget = int(capacity * 0.78)

    def vmem_estimate(tm):
        return (
            2 * tm * K * x_sz        # x tile, double-buffered
            + 2 * tm * N * o_sz      # o tile, double-buffered
            + K * R * a_sz           # A, resident (single-buffered)
            + R * N * b_sz           # B, resident
            + N * s_sz               # bias, resident
            + tm * R * 4             # t = x @ A  (f32 intermediate)
            + tm * N * 4             # y = t @ B  (f32 intermediate)
            + R * N * 4 + N * 4      # f32 casts of B / bias
        )

    # TILE_M: the whole of M for small problems, otherwise the largest
    # sublane-aligned tile that fits the VMEM budget.
    tm = min(tile_m, M)
    if tm < M:
        tm = max(sub, (tm // sub) * sub)
    while vmem_estimate(tm) > budget and tm > sub:
        tm = max(sub, ((tm // 2) // sub) * sub)

    grid_m = pl.cdiv(M, tm)   # ragged last tile handled by Pallas partial blocks
    bias2d = bias.reshape(1, N)

    vmem_limit = int(min(capacity * 94 // 100,
                         max(32 * 1024 * 1024, int(vmem_estimate(tm) * 1.5))))

    dual_core = _is_dual_tensorcore_chip()

    def build(conservative):
        if conservative:
            def resident(shape):
                return pl.BlockSpec(shape, lambda i: (0,) * len(shape))
            m_sem = pltpu.PARALLEL
        else:
            # Constant index_map -> never re-fetched; single-buffer to free VMEM.
            def resident(shape):
                return pl.BlockSpec(shape, lambda i: (0,) * len(shape),
                                    pipeline_mode=pl.Buffered(1))
            # On v7x, split the independent M tiles across both TensorCores.
            m_sem = pltpu.CORE_PARALLEL if dual_core else pltpu.PARALLEL

        return pl.pallas_call(
            _lora_kernel,
            out_shape=jax.ShapeDtypeStruct((M, N), out_dtype),
            grid_spec=pltpu.PrefetchScalarGridSpec(
                num_scalar_prefetch=0,
                grid=(grid_m,),
                in_specs=[
                    pl.BlockSpec((tm, K), lambda i: (i, 0)),   # x: streamed over M
                    resident((K, R)),                          # A: resident
                    resident((R, N)),                          # B: resident
                    resident((1, N)),                          # bias: resident
                ],
                out_specs=pl.BlockSpec((tm, N), lambda i: (i, 0)),
            ),
            compiler_params=pltpu.CompilerParams(
                dimension_semantics=(m_sem,),
                vmem_limit_bytes=vmem_limit,
            ),
        )

    try:
        return build(conservative=False)(x, a, b, bias2d)
    except Exception:
        # Fallback for jax builds without BlockSpec(pipeline_mode=...) or
        # without CORE_PARALLEL support: default double-buffering + "parallel".
        return build(conservative=True)(x, a, b, bias2d)


if __name__ == "__main__":
    # Small shapes consistent with the module: batch=8, in=32, rank=4, out=32.
    batch, in_features, rank, out_features = 8, 32, 4, 32

    key = jax.random.PRNGKey(0)
    kx, ka, kb = jax.random.split(key, 3)

    x = jax.random.normal(kx, (batch, in_features), dtype=jnp.float32)
    low_rank_matrix1 = jax.random.normal(ka, (in_features, rank), dtype=jnp.float32)
    low_rank_matrix2 = jax.random.normal(kb, (rank, out_features), dtype=jnp.float32)
    bias = jnp.zeros((out_features,), dtype=jnp.float32)

    out = jax.block_until_ready(lora_forward(x, low_rank_matrix1, low_rank_matrix2, bias))
    ref = x @ low_rank_matrix1 @ low_rank_matrix2 + bias
    assert out.shape == (batch, out_features)
    assert jnp.allclose(out, ref, atol=1e-4, rtol=1e-4)

    # Ragged-M path (M % TILE_M != 0): exercises the no-pad partial-block tail.
    x2 = jax.random.normal(key, (12, in_features), dtype=jnp.float32)
    out2 = jax.block_until_ready(
        lora_forward(x2, low_rank_matrix1, low_rank_matrix2, bias, tile_m=8))
    ref2 = x2 @ low_rank_matrix1 @ low_rank_matrix2 + bias
    assert out2.shape == ref2.shape
    assert jnp.allclose(out2, ref2, atol=1e-4, rtol=1e-4)

    print("KERNEL_OK")
</pallas_src>

<mosaic_0001>
module attributes {stable_mosaic.version = 11 : i64} {
  func.func @_lora_kernel(%arg0: i32, %arg1: memref<8x32xf32, #tpu.memory_space<vmem>>, %arg2: memref<32x4xf32, #tpu.memory_space<vmem>>, %arg3: memref<4x32xf32, #tpu.memory_space<vmem>>, %arg4: memref<1x32xf32, #tpu.memory_space<vmem>>, %arg5: memref<8x32xf32, #tpu.memory_space<vmem>>) attributes {dimension_semantics = [#tpu.dimension_semantics<parallel>], iteration_bounds = array<i64: 1>, scalar_prefetch = 0 : i64, scratch_operands = 0 : i64, tpu.core_type = #tpu.core_type<tc>, window_params = [{transform_indices = @transform_0, window_bounds = array<i64: 8, 32>}, {pipeline_mode = #tpu.pipeline_mode<synchronous>, transform_indices = @transform_1, window_bounds = array<i64: 32, 4>}, {pipeline_mode = #tpu.pipeline_mode<synchronous>, transform_indices = @transform_2, window_bounds = array<i64: 4, 32>}, {pipeline_mode = #tpu.pipeline_mode<synchronous>, transform_indices = @transform_3, window_bounds = array<i64: 1, 32>}, {transform_indices = @transform_4, window_bounds = array<i64: 8, 32>}]} {
    %c0 = arith.constant 0 : index
    %c0_0 = arith.constant 0 : index
    %0 = vector.load %arg1[%c0, %c0_0] : memref<8x32xf32, #tpu.memory_space<vmem>>, vector<8x32xf32>
    %c0_1 = arith.constant 0 : index
    %c0_2 = arith.constant 0 : index
    %1 = vector.load %arg2[%c0_1, %c0_2] : memref<32x4xf32, #tpu.memory_space<vmem>>, vector<32x4xf32>
    %cst = arith.constant dense<0.000000e+00> : vector<8x4xf32>
    %2 = tpu.matmul %0, %1, %cst {dimension_numbers = #tpu.dot_dimension_numbers<[1], [0], [0], [1], [0, 0, 1, 1], [], []>} : vector<8x32xf32>, vector<32x4xf32>, vector<8x4xf32> -> vector<8x4xf32>
    %c0_3 = arith.constant 0 : index
    %c0_4 = arith.constant 0 : index
    %3 = vector.load %arg3[%c0_3, %c0_4] : memref<4x32xf32, #tpu.memory_space<vmem>>, vector<4x32xf32>
    %cst_5 = arith.constant dense<0.000000e+00> : vector<8x32xf32>
    %4 = tpu.matmul %2, %3, %cst_5 {dimension_numbers = #tpu.dot_dimension_numbers<[1], [0], [0], [1], [0, 0, 1, 1], [], []>} : vector<8x4xf32>, vector<4x32xf32>, vector<8x32xf32> -> vector<8x32xf32>
    %c0_6 = arith.constant 0 : index
    %c0_7 = arith.constant 0 : index
    %5 = vector.load %arg4[%c0_6, %c0_7] : memref<1x32xf32, #tpu.memory_space<vmem>>, vector<1x32xf32>
    %6 = vector.broadcast %5 : vector<1x32xf32> to vector<8x32xf32>
    %7 = arith.addf %4, %6 : vector<8x32xf32>
    %c0_8 = arith.constant 0 : index
    %c0_9 = arith.constant 0 : index
    %8 = vector.load %arg5[%c0_8, %c0_9] : memref<8x32xf32, #tpu.memory_space<vmem>>, vector<8x32xf32>
    tpu.vector_store %arg5[%c0_8, %c0_9], %7 {strides = array<i32>} : memref<8x32xf32, #tpu.memory_space<vmem>>, vector<8x32xf32>,
    return
  }
  func.func @transform_0(%arg0: i32) -> (i32, i32) {
    %c0_i32 = arith.constant 0 : i32
    %c0_i32_0 = arith.constant 0 : i32
    return %arg0, %c0_i32 : i32, i32
  }
  func.func @transform_1(%arg0: i32) -> (i32, i32) {
    %c0_i32 = arith.constant 0 : i32
    %c0_i32_0 = arith.constant 0 : i32
    %c0_i32_1 = arith.constant 0 : i32
    return %c0_i32, %c0_i32_0 : i32, i32
  }
  func.func @transform_2(%arg0: i32) -> (i32, i32) {
    %c0_i32 = arith.constant 0 : i32
    %c0_i32_0 = arith.constant 0 : i32
    %c0_i32_1 = arith.constant 0 : i32
    return %c0_i32, %c0_i32_0 : i32, i32
  }
  func.func @transform_3(%arg0: i32) -> (i32, i32) {
    %c0_i32 = arith.constant 0 : i32
    %c0_i32_0 = arith.constant 0 : i32
    %c0_i32_1 = arith.constant 0 : i32
    return %c0_i32, %c0_i32_0 : i32, i32
  }
  func.func @transform_4(%arg0: i32) -> (i32, i32) {
    %c0_i32 = arith.constant 0 : i32
    %c0_i32_0 = arith.constant 0 : i32
    return %arg0, %c0_i32 : i32, i32
  }
}

module attributes {stable_mosaic.version = 11 : i64} {
  func.func @_lora_kernel(%arg0: i32, %arg1: memref<8x32xf32, #tpu.memory_space<vmem>>, %arg2: memref<32x4xf32, #tpu.memory_space<vmem>>, %arg3: memref<4x32xf32, #tpu.memory_space<vmem>>, %arg4: memref<1x32xf32, #tpu.memory_space<vmem>>, %arg5: memref<8x32xf32, #tpu.memory_space<vmem>>) attributes {dimension_semantics = [#tpu.dimension_semantics<parallel>], iteration_bounds = array<i64: 1>, scalar_prefetch = 0 : i64, scratch_operands = 0 : i64, tpu.core_type = #tpu.core_type<tc>, window_params = [{transform_indices = @transform_0, window_bounds = array<i64: 8, 32>}, {pipeline_mode = #tpu.pipeline_mode<synchronous>, transform_indices = @transform_1, window_bounds = array<i64: 32, 4>}, {pipeline_mode = #tpu.pipeline_mode<synchronous>, transform_indices = @transform_2, window_bounds = array<i64: 4, 32>}, {pipeline_mode = #tpu.pipeline_mode<synchronous>, transform_indices = @transform_3, window_bounds = array<i64: 1, 32>}, {transform_indices = @transform_4, window_bounds = array<i64: 8, 32>}]} {
    %c0 = arith.constant 0 : index
    %c0_0 = arith.constant 0 : index
    %0 = vector.load %arg1[%c0, %c0_0] : memref<8x32xf32, #tpu.memory_space<vmem>>, vector<8x32xf32>
    %c0_1 = arith.constant 0 : index
    %c0_2 = arith.constant 0 : index
    %1 = vector.load %arg2[%c0_1, %c0_2] : memref<32x4xf32, #tpu.memory_space<vmem>>, vector<32x4xf32>
    %cst = arith.constant dense<0.000000e+00> : vector<8x4xf32>
    %2 = tpu.matmul %0, %1, %cst {dimension_numbers = #tpu.dot_dimension_numbers<[1], [0], [0], [1], [0, 0, 1, 1], [], []>} : vector<8x32xf32>, vector<32x4xf32>, vector<8x4xf32> -> vector<8x4xf32>
    %c0_3 = arith.constant 0 : index
    %c0_4 = arith.constant 0 : index
    %3 = vector.load %arg3[%c0_3, %c0_4] : memref<4x32xf32, #tpu.memory_space<vmem>>, vector<4x32xf32>
    %cst_5 = arith.constant dense<0.000000e+00> : vector<8x32xf32>
    %4 = tpu.matmul %2, %3, %cst_5 {dimension_numbers = #tpu.dot_dimension_numbers<[1], [0], [0], [1], [0, 0, 1, 1], [], []>} : vector<8x4xf32>, vector<4x32xf32>, vector<8x32xf32> -> vector<8x32xf32>
    %c0_6 = arith.constant 0 : index
    %c0_7 = arith.constant 0 : index
    %5 = vector.load %arg4[%c0_6, %c0_7] : memref<1x32xf32, #tpu.memory_space<vmem>>, vector<1x32xf32>
    %6 = vector.broadcast %5 : vector<1x32xf32> to vector<8x32xf32>
    %7 = arith.addf %4, %6 : vector<8x32xf32>
    %c0_8 = arith.constant 0 : index
    %c0_9 = arith.constant 0 : index
    %8 = vector.load %arg5[%c0_8, %c0_9] : memref<8x32xf32, #tpu.memory_space<vmem>>, vector<8x32xf32>
    tpu.vector_store %arg5[%c0_8, %c0_9], %7 {strides = array<i32>} : memref<8x32xf32, #tpu.memory_space<vmem>>, vector<8x32xf32>,
    return
  }
  func.func @transform_0(%arg0: i32) -> (i32, i32) {
    %c0_i32 = arith.constant 0 : i32
    %c0_i32_0 = arith.constant 0 : i32
    return %arg0, %c0_i32 : i32, i32
  }
  func.func @transform_1(%arg0: i32) -> (i32, i32) {
    %c0_i32 = arith.constant 0 : i32
    %c0_i32_0 = arith.constant 0 : i32
    %c0_i32_1 = arith.constant 0 : i32
    return %c0_i32, %c0_i32_0 : i32, i32
  }
  func.func @transform_2(%arg0: i32) -> (i32, i32) {
    %c0_i32 = arith.constant 0 : i32
    %c0_i32_0 = arith.constant 0 : i32
    %c0_i32_1 = arith.constant 0 : i32
    return %c0_i32, %c0_i32_0 : i32, i32
  }
  func.func @transform_3(%arg0: i32) -> (i32, i32) {
    %c0_i32 = arith.constant 0 : i32
    %c0_i32_0 = arith.constant 0 : i32
    %c0_i32_1 = arith.constant 0 : i32
    return %c0_i32, %c0_i32_0 : i32, i32
  }
  func.func @transform_4(%arg0: i32) -> (i32, i32) {
    %c0_i32 = arith.constant 0 : i32
    %c0_i32_0 = arith.constant 0 : i32
    return %arg0, %c0_i32 : i32, i32
  }
}

</mosaic_0001>

<bundles_post_ra>
// kernel: tpu_custom_call.1
= control target key start
LH: loop header
LB: loop body
LE: loop exit
PB: predicated region body
PF: predicated region fallthrough
CT: control target
= control target key end

     0   :  { %v259_v3 = vmov 0.0|0.0   ;;  %vm260_vm0 = vmmov 0   ;;  %v261_v6 = vmov 0.0   ;;  %s323_s0 = inlined_call_operand.vmem [shape: f32[8,32], index: 0, kind: input, shape index: {}]   ;;  %s324_s1 = inlined_call_operand.vmem [shape: f32[32,4], index: 1, kind: input, shape index: {}]   ;;  %s325_s2 = inlined_call_operand.vmem [shape: f32[4,32], index: 2, kind: input, shape index: {}]   ;;  %s326_s3 = inlined_call_operand.vmem [shape: f32[1,32], index: 3, kind: input, shape index: {}]   ;;  %s327_s4 = inlined_call_operand.hbm [shape: f32[8,32], index: 4, kind: output, shape index: {}]  }
   0x1   :  { %v19_v0 = vld [vmem:[%s324_s1] sm:$0xff]  ;;  %v20_v1 = vld [vmem:[%s324_s1 + $0x8] sm:$0xff]  ;;  %v21_v2 = vld [vmem:[%s324_s1 + $0x10] sm:$0xff]  ;;  %225 = vmatprep.subr.bf16.mxu0 %v259_v3  ;;  %217 = vmatprep.mubr.msk.f32.mxu0 %vm260_vm0, %v261_v6 }
   0x2   :  { %v226_v4 = vpack.c.bf16 %v20_v1, %v19_v0  ;;  %v22_v5 = vld [vmem:[%s324_s1 + $0x18] sm:$0xff] }
   0x3   :  { %9 = vsyncpa [#allocation3], 0  ;;  %220 = vmatprep.subr.mxu1 %v261_v6  ;;  %222 = vmatprep.mubr.msk.f32.mxu1 %vm260_vm0, %v261_v6  ;;  %v229_v7 = vpack.c.bf16 %v22_v5, %v21_v2  ;;  %v18_v8 = vld [vmem:[%s323_s0] sm:$0xff]  ;;  %vm23_vm1 = vcmask 261120   ;;  %vm109_vm2 = vcmask 1043456   ;;  %vm105_vm3 = vcmask 31744  }
   0x4   :  { %227 = vmatpush3.bf16.msra.mxu0 %v226_v4  ;;  %v97_v9 = vld [vmem:[%s325_s2] sm:$0xf]  ;;  %s262_s28 = smov [#allocation2]  }
   0x5   :  { %228 = vmatprep.subr.bf16.mxu0 %v259_v3  ;;  %221 = vmatpush3.msk.msra.mxu1 %vm109_vm2, %v97_v9  ;;  %v199_v12 = vld [vmem:[%s326_s3] ss:$0 sm:$0xff]  ;;  %s190_s29 = sshll.u32 %s262_s28, 4  ;;  %s191_s29 = int_to_ptr.vmem [resolvable:$true] %s190_s29 }
   0x6   :  { %s235_s0 = scalar_lea.vmem %s191_s29, 128  ;;  %p240_p1 = scmp.lt.s32.totalorder %s191_s29, %s191_s29 }
   0x7   :  { %p236_p0 = scmp.ne.s32.totalorder %s191_s29, %s235_s0  ;;  %p241_p2 = scmp.lt.s32.totalorder %s235_s0, %s235_s0 }
   0x8   :  { %230 = vmatpush3.bf16.msra.mxu0 %v229_v7 }
   0x9   :  { %p242_p3 = por %p241_p2, %p240_p1 }
   0xb   :  { %218 = vmatmul.mubr.msk.f32.vlgmr.msra.gmra.mrb[0].mxu0 %vm23_vm1, %v18_v8  ;;  %p243_p4 = pnand %p242_p3, %p236_p0 }
  0xde   :  { %v93_v10 = vpop.f32.mrb[0].mxu0 }
  0xdf   :  { %v219_v11 = vpop.f32.mrb[1].mxu0  ;;  %223 = vmatmul.mubr.msk.f32.vlgmr.msra.gmra.mrb[0].mxu1 %vm105_vm3, %v93_v10 }
 0x1b2   :  { %v179_v13 = vpop.f32.mrb[0].mxu1 }
 0x1b3   :  { %v180_v14 = vadd.f32 %v199_v12, %v179_v13  ;;  %v224_v15 = vpop.f32.mrb[1].mxu1 }
 0x1b5   :  { %183 = vst.msk [vmem:[#allocation2] sm:$0xff] %vm23_vm1, %v180_v14 }
 0x1b6   :  { %246 = shalt.err (!%p243_p4)
}
 0x1b7   :  { %s247_s5 = scalar_lea.hbm %s327_s4, 128 }
 0x1b8   :  { %p248_p5 = scmp.ne.s32.totalorder %s327_s4, %s247_s5  ;;  %p251_p6 = scmp.lt.u32.totalorder %s247_s5, %s327_s4 }
 0x1ba   :  { %p253_p7 = pnand %p251_p6, %p248_p5 }
 0x1bc   :  { %256 = shalt.err (!%p253_p7)
}
 0x1bd   :  { %193 = dma.vmem_to_hbm [thread:$0]  %s191_s29, 128, %s327_s4, [#allocation3]  }
 0x1be   :  { %257 = dma.done.wait [#allocation3], 128  }
 0x1bf   :  { %258 = vsyncadd [#allocation3], 4294967168 }
 0x1c0   :  { %197 = vsyncpa [#allocation3], 1 }

// kernel: tpu_custom_call.1
= control target key start
LH: loop header
LB: loop body
LE: loop exit
PB: predicated region body
PF: predicated region fallthrough
CT: control target
= control target key end

     0   :  { %v259_v3 = vmov 0.0|0.0   ;;  %vm260_vm0 = vmmov 0   ;;  %v261_v6 = vmov 0.0   ;;  %s323_s0 = inlined_call_operand.vmem [shape: f32[8,32], index: 0, kind: input, shape index: {}]   ;;  %s324_s1 = inlined_call_operand.vmem [shape: f32[32,4], index: 1, kind: input, shape index: {}]   ;;  %s325_s2 = inlined_call_operand.vmem [shape: f32[4,32], index: 2, kind: input, shape index: {}]   ;;  %s326_s3 = inlined_call_operand.vmem [shape: f32[1,32], index: 3, kind: input, shape index: {}]   ;;  %s327_s4 = inlined_call_operand.hbm [shape: f32[8,32], index: 4, kind: output, shape index: {}]  }
   0x1   :  { %v19_v0 = vld [vmem:[%s324_s1] sm:$0xff]  ;;  %v20_v1 = vld [vmem:[%s324_s1 + $0x8] sm:$0xff]  ;;  %v21_v2 = vld [vmem:[%s324_s1 + $0x10] sm:$0xff]  ;;  %225 = vmatprep.subr.bf16.mxu0 %v259_v3  ;;  %217 = vmatprep.mubr.msk.f32.mxu0 %vm260_vm0, %v261_v6 }
   0x2   :  { %v226_v4 = vpack.c.bf16 %v20_v1, %v19_v0  ;;  %v22_v5 = vld [vmem:[%s324_s1 + $0x18] sm:$0xff] }
   0x3   :  { %9 = vsyncpa [#allocation3], 0  ;;  %220 = vmatprep.subr.mxu1 %v261_v6  ;;  %222 = vmatprep.mubr.msk.f32.mxu1 %vm260_vm0, %v261_v6  ;;  %v229_v7 = vpack.c.bf16 %v22_v5, %v21_v2  ;;  %v18_v8 = vld [vmem:[%s323_s0] sm:$0xff]  ;;  %vm23_vm1 = vcmask 261120   ;;  %vm109_vm2 = vcmask 1043456   ;;  %vm105_vm3 = vcmask 31744  }
   0x4   :  { %227 = vmatpush3.bf16.msra.mxu0 %v226_v4  ;;  %v97_v9 = vld [vmem:[%s325_s2] sm:$0xf]  ;;  %s262_s28 = smov [#allocation2]  }
   0x5   :  { %228 = vmatprep.subr.bf16.mxu0 %v259_v3  ;;  %221 = vmatpush3.msk.msra.mxu1 %vm109_vm2, %v97_v9  ;;  %v199_v12 = vld [vmem:[%s326_s3] ss:$0 sm:$0xff]  ;;  %s190_s29 = sshll.u32 %s262_s28, 4  ;;  %s191_s29 = int_to_ptr.vmem [resolvable:$true] %s190_s29 }
   0x6   :  { %s235_s0 = scalar_lea.vmem %s191_s29, 128  ;;  %p240_p1 = scmp.lt.s32.totalorder %s191_s29, %s191_s29 }
   0x7   :  { %p236_p0 = scmp.ne.s32.totalorder %s191_s29, %s235_s0  ;;  %p241_p2 = scmp.lt.s32.totalorder %s235_s0, %s235_s0 }
   0x8   :  { %230 = vmatpush3.bf16.msra.mxu0 %v229_v7 }
   0x9   :  { %p242_p3 = por %p241_p2, %p240_p1 }
   0xb   :  { %218 = vmatmul.mubr.msk.f32.vlgmr.msra.gmra.mrb[0].mxu0 %vm23_vm1, %v18_v8  ;;  %p243_p4 = pnand %p242_p3, %p236_p0 }
  0xde   :  { %v93_v10 = vpop.f32.mrb[0].mxu0 }
  0xdf   :  { %v219_v11 = vpop.f32.mrb[1].mxu0  ;;  %223 = vmatmul.mubr.msk.f32.vlgmr.msra.gmra.mrb[0].mxu1 %vm105_vm3, %v93_v10 }
 0x1b2   :  { %v179_v13 = vpop.f32.mrb[0].mxu1 }
 0x1b3   :  { %v180_v14 = vadd.f32 %v199_v12, %v179_v13  ;;  %v224_v15 = vpop.f32.mrb[1].mxu1 }
 0x1b5   :  { %183 = vst.msk [vmem:[#allocation2] sm:$0xff] %vm23_vm1, %v180_v14 }
 0x1b6   :  { %246 = shalt.err (!%p243_p4)
}
 0x1b7   :  { %s247_s5 = scalar_lea.hbm %s327_s4, 128 }
 0x1b8   :  { %p248_p5 = scmp.ne.s32.totalorder %s327_s4, %s247_s5  ;;  %p251_p6 = scmp.lt.u32.totalorder %s247_s5, %s327_s4 }
 0x1ba   :  { %p253_p7 = pnand %p251_p6, %p248_p5 }
 0x1bc   :  { %256 = shalt.err (!%p253_p7)
}
 0x1bd   :  { %193 = dma.vmem_to_hbm [thread:$0]  %s191_s29, 128, %s327_s4, [#allocation3]  }
 0x1be   :  { %257 = dma.done.wait [#allocation3], 128  }
 0x1bf   :  { %258 = vsyncadd [#allocation3], 4294967168 }
 0x1c0   :  { %197 = vsyncpa [#allocation3], 1 }

</bundles_post_ra>
